<compile_context>
chip_gen: v5e
topology: v5e:2x2
jax: 0.10.0
libtpu: 0.0.40
codegen_flags: <defaults>
</compile_context>

<pallas_src>
import functools

import jax
import jax.numpy as jnp
from jax import lax
from jax.experimental import pallas as pl
from jax.experimental.pallas import tpu as pltpu


def _round_up(x, m):
    return ((x + m - 1) // m) * m


def _sublane_pack(dtype):
    """Sublane packing factor: 8 for 32-bit, 16 for bf16, 32 for int8/fp8."""
    return 8 * max(1, 4 // jnp.dtype(dtype).itemsize)


def _block_rows(b, per_row_padded_bytes, multiple):
    """Rows of the folded N*C axis per block.

    Targets ~1.5 MiB of padded (in + out) VMEM per block and >= 4 pipeline
    steps when blocks can stay >= ~128 KiB (per-step overhead ~0.35 us is
    negligible above that).  `multiple` keeps the block's second-minor dim
    legal when the batch axis sits on sublanes (flat layout).
    """
    cap = max(1, (3 << 19) // per_row_padded_bytes)          # ~1.5 MiB cap
    floor_rows = max(1, (1 << 17) // per_row_padded_bytes)    # ~128 KiB floor
    rows = min(b, cap, max(floor_rows, pl.cdiv(b, 4)))
    if rows < b and multiple > 1:
        rows = max(multiple, (rows // multiple) * multiple)
        rows = min(rows, b)
    return rows


def _pool3x3_flat_kernel(x_ref, o_ref, *, w_img):
    """Stride-1 3x3 max pool (padding=1) on a lane-dense (Bt, H*W) tile."""
    x = x_ref[...]
    hw = x.shape[-1]
    pos = lax.broadcasted_iota(jnp.int32, x.shape, 1)         # flat spatial idx
    col = jnp.bitwise_and(pos, w_img - 1)                     # pos % W (W=2^k)

    # --- W pass: r[p] = max(x[p-1], x[p], x[p+1]) within each image row. ---
    left = pltpu.roll(x, shift=1, axis=1)                     # left[p]  = x[p-1]
    right = pltpu.roll(x, shift=hw - 1, axis=1)               # right[p] = x[p+1]
    r = jnp.maximum(x, jnp.where(col > 0, left, x))
    r = jnp.maximum(r, jnp.where(col < w_img - 1, right, x))

    # --- H pass: y[p] = max(r[p-W], r[p], r[p+W]). ---
    if hw > w_img:                                            # more than one row
        up = pltpu.roll(r, shift=w_img, axis=1)               # up[p]   = r[p-W]
        down = pltpu.roll(r, shift=hw - w_img, axis=1)        # down[p] = r[p+W]
        y = jnp.maximum(r, jnp.where(pos >= w_img, up, r))
        y = jnp.maximum(y, jnp.where(pos < hw - w_img, down, r))
    else:
        y = r

    o_ref[...] = y                                            # single store


def _pool3x3_nchw_kernel(x_ref, o_ref, *, stride):
    """3x3 max pool (padding=1) on a (Bt, H, W) tile; strided subsample last."""
    x = x_ref[...]
    bt, h, w = x.shape

    # --- H (sublane) pass ---
    if h > 1:
        row = lax.broadcasted_iota(jnp.int32, x.shape, 1)
        up = pltpu.roll(x, shift=1, axis=1)                   # up[h]   = x[h-1]
        down = pltpu.roll(x, shift=h - 1, axis=1)             # down[h] = x[h+1]
        r = jnp.maximum(x, jnp.where(row > 0, up, x))
        r = jnp.maximum(r, jnp.where(row < h - 1, down, x))
    else:
        r = x

    # --- W (lane) pass ---
    if w > 1:
        col = lax.broadcasted_iota(jnp.int32, x.shape, 2)
        left = pltpu.roll(r, shift=1, axis=2)
        right = pltpu.roll(r, shift=w - 1, axis=2)
        y = jnp.maximum(r, jnp.where(col > 0, left, r))
        y = jnp.maximum(y, jnp.where(col < w - 1, right, r))
    else:
        y = r

    if stride == 1:
        o_ref[...] = y
    else:
        _, ho, wo = o_ref.shape
        # TODO(synk): compute only the strided output rows/cols directly; the
        # extra max work is VPU filler on this memory-bound kernel.
        o_ref[...] = lax.slice(
            y, (0, 0, 0),
            (bt, stride * (ho - 1) + 1, stride * (wo - 1) + 1),
            (1, stride, stride))


def max_pool_3x3(x_nchw, stride=1):
    """Equivalent of nn.MaxPool2d(3, stride=stride, padding=1) on NCHW input."""
    n, c, h, w = x_nchw.shape
    ho = (h - 1) // stride + 1
    wo = (w - 1) // stride + 1
    b = n * c
    dtype = x_nchw.dtype
    itemsize = jnp.dtype(dtype).itemsize
    sub = _sublane_pack(dtype)

    # Lane-dense fast path: fold (H, W) onto the lane axis so small-W NAS
    # feature maps fill the 128-lane vregs.  Needs W to be a power of two so
    # the column border mask is a bitwise AND (no vector integer modulo).
    use_flat = (stride == 1 and 2 <= w < 128 and (w & (w - 1)) == 0
                and h * w <= 32768)

    if use_flat:
        hw = h * w
        x = x_nchw.reshape(b, hw)                             # free, contiguous
        in_row = _round_up(hw, 128) * itemsize                # padded bytes/row
        out_row = in_row
        bt = _block_rows(b, in_row + out_row, sub)            # sublane-legal
        block_bytes = _round_up(bt, sub) * (in_row + out_row)
        kernel = functools.partial(_pool3x3_flat_kernel, w_img=w)
        in_specs = [pl.BlockSpec((bt, hw), lambda i: (i, 0))]
        out_specs = pl.BlockSpec((bt, hw), lambda i: (i, 0))
        out_shape = jax.ShapeDtypeStruct((b, hw), dtype)
    else:
        x = x_nchw.reshape(b, h, w)                           # free, contiguous
        in_row = _round_up(h, sub) * _round_up(w, 128) * itemsize
        out_row = _round_up(ho, sub) * _round_up(wo, 128) * itemsize
        bt = _block_rows(b, in_row + out_row, 1)              # bt is a major dim
        block_bytes = bt * (in_row + out_row)
        kernel = functools.partial(_pool3x3_nchw_kernel, stride=stride)
        in_specs = [pl.BlockSpec((bt, h, w), lambda i: (i, 0, 0))]
        out_specs = pl.BlockSpec((bt, ho, wo), lambda i: (i, 0, 0))
        out_shape = jax.ShapeDtypeStruct((b, ho, wo), dtype)

    grid = (pl.cdiv(b, bt),)
    # Double-buffered in+out plus headroom; explicit so we never depend on the
    # per-generation default scoped-VMEM limit (v5e 16 MiB; v7x 64 MiB VMEM).
    vmem_limit = int(min(32 << 20, max(8 << 20, 4 * block_bytes + (1 << 20))))

    cost = pl.CostEstimate(
        flops=8 * b * ho * wo,                                # ~8 max per output
        transcendentals=0,
        bytes_accessed=(b * h * w + b * ho * wo) * itemsize)

    out = pl.pallas_call(
        kernel,
        out_shape=out_shape,
        grid_spec=pltpu.PrefetchScalarGridSpec(
            num_scalar_prefetch=0,
            grid=grid,
            in_specs=in_specs,
            out_specs=out_specs),
        compiler_params=pltpu.CompilerParams(
            dimension_semantics=("parallel",),
            vmem_limit_bytes=vmem_limit),
        cost_estimate=cost,
    )(x)

    return out.reshape(n, c, ho, wo)


class NewMixedOpMax:
    """JAX/Pallas port of NewMixedOp_max: applies the chosen *_max primitive."""

    def __init__(self, c_in, c_out, stride, chosen_op):
        # Max pooling has no learnable parameters; c_in == c_out for this op.
        del c_in, c_out, chosen_op
        self.stride = stride

    def __call__(self, x_nchw):
        return max_pool_3x3(x_nchw, stride=self.stride)


if __name__ == "__main__":
    key = jax.random.PRNGKey(0)
    N, C, H, W = 2, 4, 16, 16
    x = jax.random.normal(key, (N, C, H, W), dtype=jnp.float32)

    def ref_pool(v, s):
        return lax.reduce_window(
            v, -jnp.inf, lax.max,
            window_dimensions=(1, 1, 3, 3),
            window_strides=(1, 1, s, s),
            padding=((0, 0), (0, 0), (1, 1), (1, 1)))

    # stride=1 (lane-dense flat path)
    op1 = NewMixedOpMax(c_in=C, c_out=C, stride=1, chosen_op=(0, 1))
    y1 = jax.block_until_ready(op1(x))
    assert y1.shape == (N, C, H, W)
    assert jnp.allclose(y1, ref_pool(x, 1)), "stride=1 mismatch vs reference"

    # stride=2 (general NCHW path, used by reduction cells)
    op2 = NewMixedOpMax(c_in=C, c_out=C, stride=2, chosen_op=(0, 1))
    y2 = jax.block_until_ready(op2(x))
    assert y2.shape == (N, C, H // 2, W // 2)
    assert jnp.allclose(y2, ref_pool(x, 2)), "stride=2 mismatch vs reference"

    print("KERNEL_OK")
</pallas_src>

<mosaic_0001>
module attributes {stable_mosaic.version = 11 : i64} {
  func.func @_pool3x3_flat_kernel(%arg0: i32, %arg1: memref<8x256xf32, #tpu.memory_space<vmem>>, %arg2: memref<8x256xf32, #tpu.memory_space<vmem>>) attributes {dimension_semantics = [#tpu.dimension_semantics<parallel>], iteration_bounds = array<i64: 1>, scalar_prefetch = 0 : i64, scratch_operands = 0 : i64, tpu.core_type = #tpu.core_type<tc>, window_params = [{transform_indices = @transform_0, window_bounds = array<i64: 8, 256>}, {transform_indices = @transform_1, window_bounds = array<i64: 8, 256>}]} {
    %c0 = arith.constant 0 : index
    %c0_0 = arith.constant 0 : index
    %0 = vector.load %arg1[%c0, %c0_0] : memref<8x256xf32, #tpu.memory_space<vmem>>, vector<8x256xf32>
    %1 = tpu.iota {dimensions = array<i32: 1>} : vector<8x256xi32>
    %c15_i32 = arith.constant 15 : i32
    %2 = vector.broadcast %c15_i32 : i32 to vector<8x256xi32>
    %3 = arith.andi %1, %2 : vector<8x256xi32>
    %c1_i32 = arith.constant 1 : i32
    %4 = tpu.dynamic_rotate %0 by %c1_i32 dim 1 : vector<8x256xf32>, i32 -> vector<8x256xf32>
    %c255_i32 = arith.constant 255 : i32
    %5 = tpu.dynamic_rotate %0 by %c255_i32 dim 1 : vector<8x256xf32>, i32 -> vector<8x256xf32>
    %c0_i32 = arith.constant 0 : i32
    %6 = vector.broadcast %c0_i32 : i32 to vector<8x256xi32>
    %7 = arith.cmpi sgt, %3, %6 : vector<8x256xi32>
    %8 = arith.select %7, %4, %0 : vector<8x256xi1>, vector<8x256xf32>
    %9 = arith.maximumf %0, %8 : vector<8x256xf32>
    %c15_i32_1 = arith.constant 15 : i32
    %10 = vector.broadcast %c15_i32_1 : i32 to vector<8x256xi32>
    %11 = arith.cmpi slt, %3, %10 : vector<8x256xi32>
    %12 = arith.select %11, %5, %0 : vector<8x256xi1>, vector<8x256xf32>
    %13 = arith.maximumf %9, %12 : vector<8x256xf32>
    %c16_i32 = arith.constant 16 : i32
    %14 = tpu.dynamic_rotate %13 by %c16_i32 dim 1 : vector<8x256xf32>, i32 -> vector<8x256xf32>
    %c240_i32 = arith.constant 240 : i32
    %15 = tpu.dynamic_rotate %13 by %c240_i32 dim 1 : vector<8x256xf32>, i32 -> vector<8x256xf32>
    %c16_i32_2 = arith.constant 16 : i32
    %16 = vector.broadcast %c16_i32_2 : i32 to vector<8x256xi32>
    %17 = arith.cmpi sge, %1, %16 : vector<8x256xi32>
    %18 = arith.select %17, %14, %13 : vector<8x256xi1>, vector<8x256xf32>
    %19 = arith.maximumf %13, %18 : vector<8x256xf32>
    %c240_i32_3 = arith.constant 240 : i32
    %20 = vector.broadcast %c240_i32_3 : i32 to vector<8x256xi32>
    %21 = arith.cmpi slt, %1, %20 : vector<8x256xi32>
    %22 = arith.select %21, %15, %13 : vector<8x256xi1>, vector<8x256xf32>
    %23 = arith.maximumf %19, %22 : vector<8x256xf32>
    %c0_4 = arith.constant 0 : index
    %c0_5 = arith.constant 0 : index
    %24 = vector.load %arg2[%c0_4, %c0_5] : memref<8x256xf32, #tpu.memory_space<vmem>>, vector<8x256xf32>
    tpu.vector_store %arg2[%c0_4, %c0_5], %23 {strides = array<i32>} : memref<8x256xf32, #tpu.memory_space<vmem>>, vector<8x256xf32>,
    return
  }
  func.func @transform_0(%arg0: i32) -> (i32, i32) {
    %c0_i32 = arith.constant 0 : i32
    %c0_i32_0 = arith.constant 0 : i32
    return %arg0, %c0_i32 : i32, i32
  }
  func.func @transform_1(%arg0: i32) -> (i32, i32) {
    %c0_i32 = arith.constant 0 : i32
    %c0_i32_0 = arith.constant 0 : i32
    return %arg0, %c0_i32 : i32, i32
  }
}

</mosaic_0001>

<bundles_post_ra>
// kernel: tpu_custom_call.1
= control target key start
LH: loop header
LB: loop body
LE: loop exit
PB: predicated region body
PF: predicated region fallthrough
CT: control target
= control target key end

     0   :  { %6 = vsyncpa [#allocation3], 0  ;;  %s181_s0 = inlined_call_operand.hbm [shape: f32[8,256], index: 0, kind: input, shape index: {}]   ;;  %s182_s1 = inlined_call_operand.hbm [shape: f32[8,256], index: 1, kind: output, shape index: {}]  }
   0x1   :  { %7 = vsyncpa [#allocation4], 0  ;;  %s13_s8 = sshll.u32 %s181_s0, 4  ;;  %s159_s9 = smov [#allocation2]   ;;  %s14_s8 = int_to_ptr.hbm [resolvable:$true] %s13_s8 }
   0x2   :  { %s15_s10 = sshll.u32 %s159_s9, 4  ;;  %s16_s10 = int_to_ptr.vmem [resolvable:$true] %s15_s10 }
   0x3   :  { %18 = dma.hbm_to_vmem [thread:$0]  %s14_s8, 256, %s16_s10, [#allocation3]  }
   0x4   :  { %155 = dma.done.wait [#allocation3], 256  }
   0x5   :  { %156 = vsyncadd [#allocation3], 4294967040  ;;  %v23_v0 = vld [vmem:[#allocation2] sm:$0xff]  ;;  %s160_s11 = smov 127   ;;  %s161_s12 = smov 1   ;;  %v24_v1 = vld [vmem:[#allocation2 + $0x8] sm:$0xff]  ;;  %v25_v2 = vlaneseq }
   0x6   :  { %37 = vrot.lane.b32.xlu1 %v23_v0, %s160_s11  ;;  %30 = vrot.lane.b32.xlu0 %v23_v0, %s161_s12  ;;  %s162_s0 = smov 112   ;;  %s163_s13 = smov 16  }
   0x7   :  { %v26_v3 = vand.u32 127, %v25_v2  ;;  %s164_s14 = smov [#allocation5]   ;;  %s91_s18 = sshll.u32 %s182_s1, 4  ;;  %s92_s18 = int_to_ptr.hbm [resolvable:$true] %s91_s18 }
   0x8   :  { %s89_s15 = sshll.u32 %s164_s14, 4  ;;  %s90_s15 = int_to_ptr.vmem [resolvable:$true] %s89_s15 }
   0x9   :  { %v27_v4 = vadd.s32 128, %v26_v3  ;;  %v28_v7 = vand.u32 15, %v26_v3  ;;  %vm41_vm0 = vcmp.lt.s32.totalorder %v26_v3, 127  ;;  %vm34_vm1 = vcmp.lt.s32.totalorder %v26_v3, 1 }
   0xa   :  { %vm60_vm6 = vcmp.lt.s32.totalorder %v26_v3, 16  ;;  %vm70_vm7 = vcmp.ge.s32.totalorder %v26_v3, 16  ;;  %vm67_vm8 = vcmp.lt.s32.totalorder %v26_v3, 112 }
   0xb   :  { %v29_v8 = vand.u32 15, %v27_v4  ;;  %vm44_vm2 = vcmp.gt.s32.totalorder %v28_v7, 0  ;;  %vm50_vm4 = vcmp.lt.s32.totalorder %v28_v7, 15  ;;  %vm77_vm9 = vcmp.lt.s32.totalorder %v27_v4, 240 }
   0xd   :  { %vm45_vm3 = vcmp.gt.s32.totalorder %v29_v8, 0  ;;  %vm51_vm5 = vcmp.lt.s32.totalorder %v29_v8, 15 }
   0xe   :  { %39 = vrot.lane.b32.xlu1 %v24_v1, %s160_s11  ;;  %32 = vrot.lane.b32.xlu0 %v24_v1, %s161_s12 }
  0x78   :  { %v38_v5 = vpop.permute.xlu1 %37  ;;  %v31_v6 = vpop.permute.xlu0 %30 }
  0x80   :  { %v40_v9 = vpop.permute.xlu1 %39  ;;  %v33_v10 = vpop.permute.xlu0 %32 }
  0x81   :  { %v42_v11 = vsel %vm41_vm0, %v38_v5, %v40_v9  ;;  %v43_v12 = vsel %vm41_vm0, %v40_v9, %v38_v5  ;;  %v35_v13 = vsel %vm34_vm1, %v31_v6, %v33_v10  ;;  %v36_v14 = vsel %vm34_vm1, %v33_v10, %v31_v6 }
  0x82   :  { %v46_v15 = vsel %vm44_vm2, %v36_v14, %v23_v0  ;;  %v47_v16 = vsel %vm45_vm3, %v35_v13, %v24_v1  ;;  %v52_v19 = vsel %vm50_vm4, %v42_v11, %v23_v0  ;;  %v53_v20 = vsel %vm51_vm5, %v43_v12, %v24_v1 }
  0x83   :  { %v48_v17 = vmax.f32 %v23_v0, %v46_v15  ;;  %v49_v18 = vmax.f32 %v24_v1, %v47_v16 }
  0x85   :  { %v54_v21 = vmax.f32 %v48_v17, %v52_v19  ;;  %v55_v22 = vmax.f32 %v49_v18, %v53_v20 }
  0x87   :  { %63 = vrot.lane.b32.xlu0 %v54_v21, %s162_s0  ;;  %56 = vrot.lane.b32.xlu2 %v54_v21, %s163_s13 }
  0x88   :  { %65 = vrot.lane.b32.xlu1 %v55_v22, %s162_s0 }
  0x8f   :  { %58 = vrot.lane.b32.xlu2 %v55_v22, %s163_s13 }
  0xe1   :  { %v57_v23 = vpop.permute.xlu2 %56 }
  0xe9   :  { %v59_v24 = vpop.permute.xlu2 %58 }
  0xea   :  { %v62_v25 = vsel %vm60_vm6, %v59_v24, %v57_v23  ;;  %v61_v27 = vsel %vm60_vm6, %v57_v23, %v59_v24 }
  0xeb   :  { %v72_v26 = vsel %vm70_vm7, %v62_v25, %v54_v21  ;;  %v75_v31 = vmax.f32 %v55_v22, %v61_v27 }
  0xec   :  { %v74_v30 = vmax.f32 %v54_v21, %v72_v26 }
  0xf9   :  { %v64_v28 = vpop.permute.xlu0 %63 }
  0xfa   :  { %v66_v29 = vpop.permute.xlu1 %65 }
  0xfb   :  { %v68_v32 = vsel %vm67_vm8, %v64_v28, %v66_v29  ;;  %v69_v33 = vsel %vm67_vm8, %v66_v29, %v64_v28 }
  0xfc   :  { %v79_v34 = vsel %vm77_vm9, %v69_v33, %v55_v22  ;;  %v80_v35 = vmax.f32 %v74_v30, %v68_v32 }
  0xfd   :  { %v81_v36 = vmax.f32 %v75_v31, %v79_v34 }
  0xfe   :  { %82 = vst [vmem:[#allocation5] sm:$0xff] %v80_v35 }
  0xff   :  { %83 = vst [vmem:[#allocation5 + $0x8] sm:$0xff] %v81_v36 }
 0x100   :  { %94 = dma.vmem_to_hbm [thread:$0]  %s90_s15, 256, %s92_s18, [#allocation4]  }
 0x101   :  { %157 = dma.done.wait [#allocation4], 256  }
 0x102   :  { %158 = vsyncadd [#allocation4], 4294967040 }
 0x103   :  { %99 = vsyncpa [#allocation3], 1 }
 0x104   :  { %100 = vsyncpa [#allocation4], 1 }

</bundles_post_ra>
